<compile_context>
chip_gen: v5e
topology: v5e:2x2
jax: 0.10.0
libtpu: 0.0.40
codegen_flags: <defaults>
</compile_context>

<pallas_src>
import math

import jax
import jax.numpy as jnp
from jax.experimental import pallas as pl
from jax.experimental.pallas import tpu as pltpu


# -----------------------------------------------------------------------------
# Kernel
# -----------------------------------------------------------------------------
def policy_kernel(x_ref, w1_ref, b1_ref, w2_ref, b2_ref, wh_ref, bh_ref,
                  mask_ref, vsel_ref, out_ref):
    """One batch tile of the fused policy/value forward pass (operands in VMEM).

    Output layout per row (lane-dense, HEAD_W=128 wide):
      cols [0:A]  -> softmax action probabilities
      col  A      -> state value
      cols > A    -> 0
    """
    wdt = w1_ref.dtype                       # weight dtype (bf16)
    x = x_ref[...]                           # (TB, obs_dim) f32

    # Shared trunk: fc1 -> relu -> fc2 -> relu.  bf16 x bf16 matmuls, f32 accumulate.
    h1 = jnp.dot(x.astype(wdt), w1_ref[...],
                 preferred_element_type=jnp.float32) + b1_ref[...]
    h1 = jnp.maximum(h1, 0.0)                # (TB, H) f32
    h2 = jnp.dot(h1.astype(wdt), w2_ref[...],
                 preferred_element_type=jnp.float32) + b2_ref[...]
    h2 = jnp.maximum(h2, 0.0)                # (TB, H) f32

    # Fused action + value head: cols [0:A] = logits, col A = value, rest 0-pad.
    head = jnp.dot(h2.astype(wdt), wh_ref[...],
                   preferred_element_type=jnp.float32) + bh_ref[...]   # (TB, HEAD_W)

    # Softmax over the real logit columns only: additive mask row is 0 there and
    # -1e30 on padded columns, so padded columns contribute exp() == 0.
    logits = head + mask_ref[...]
    m = jnp.max(logits, axis=-1, keepdims=True)
    e = jnp.exp(logits - m)
    s = jnp.sum(e, axis=-1, keepdims=True)
    probs = e / s                            # exact normalization (rows sum to 1)

    # Drop the state value into column A (probs there are exactly 0); one store.
    out_ref[...] = probs + head * vsel_ref[...]


# -----------------------------------------------------------------------------
# Wrapper
# -----------------------------------------------------------------------------
def policy_forward(state, params, action_dim, *, tile_b=256, interpret=False):
    """state: (B, obs_dim) f32. Returns (action_prob (B, A), state_value (B, 1))."""
    B, obs_dim = state.shape
    hidden = params["w2"].shape[0]
    head_w = params["wh"].shape[1]           # lane-padded fused-head width (>= A+1)

    # Right-size padding:
    #   * small acting batches -> pad only to a multiple of 8 rows, single tile;
    #   * large training batches -> tile at tile_b (>=2 grid steps => v7x megacore).
    tile_b = max(8, int(tile_b))
    if B <= tile_b:
        b_pad = ((B + 7) // 8) * 8
        tile_b = b_pad
    else:
        b_pad = ((B + tile_b - 1) // tile_b) * tile_b
    x = state if b_pad == B else jnp.pad(state, ((0, b_pad - B), (0, 0)))

    out_pad = pl.pallas_call(
        policy_kernel,
        out_shape=jax.ShapeDtypeStruct((b_pad, head_w), jnp.float32),
        grid_spec=pltpu.PrefetchScalarGridSpec(
            num_scalar_prefetch=0,
            grid=(b_pad // tile_b,),
            in_specs=[
                pl.BlockSpec((tile_b, obs_dim), lambda i: (i, 0)),   # state tile
                pl.BlockSpec((obs_dim, hidden), lambda i: (0, 0)),   # w1 (resident)
                pl.BlockSpec((1, hidden),       lambda i: (0, 0)),   # b1
                pl.BlockSpec((hidden, hidden),  lambda i: (0, 0)),   # w2
                pl.BlockSpec((1, hidden),       lambda i: (0, 0)),   # b2
                pl.BlockSpec((hidden, head_w),  lambda i: (0, 0)),   # fused head W
                pl.BlockSpec((1, head_w),       lambda i: (0, 0)),   # fused head b
                pl.BlockSpec((1, head_w),       lambda i: (0, 0)),   # softmax mask row
                pl.BlockSpec((1, head_w),       lambda i: (0, 0)),   # value selector row
            ],
            out_specs=pl.BlockSpec((tile_b, head_w), lambda i: (i, 0)),
        ),
        compiler_params=pltpu.CompilerParams(
            dimension_semantics=("parallel",)),                      # megacore on v7x
        interpret=interpret,
    )(x, params["w1"], params["b1"], params["w2"], params["b2"],
      params["wh"], params["bh"], params["mask"], params["vsel"])

    action_prob = out_pad[:B, :action_dim]
    state_value = out_pad[:B, action_dim:action_dim + 1]
    return action_prob, state_value


# -----------------------------------------------------------------------------
# Init (Xavier-uniform weights as in the PyTorch module, PyTorch-default biases).
# Head fusion, lane padding, softmax mask and value-selector rows are built
# here, ONCE, not per forward.
# -----------------------------------------------------------------------------
def init_params(key, obs_dim, action_dim, hidden=256, weight_dtype=jnp.bfloat16):
    def xavier(k, fan_in, fan_out):
        bound = math.sqrt(6.0 / (fan_in + fan_out))
        return jax.random.uniform(k, (fan_in, fan_out), jnp.float32, -bound, bound)

    def bias(k, fan_in, fan_out):
        bound = 1.0 / math.sqrt(fan_in)
        return jax.random.uniform(k, (1, fan_out), jnp.float32, -bound, bound)

    ks = jax.random.split(key, 8)
    w1 = xavier(ks[0], obs_dim, hidden); b1 = bias(ks[1], obs_dim, hidden)
    w2 = xavier(ks[2], hidden, hidden);  b2 = bias(ks[3], hidden, hidden)
    wa = xavier(ks[4], hidden, action_dim); ba = bias(ks[5], hidden, action_dim)
    wv = xavier(ks[6], hidden, 1);          bv = bias(ks[7], hidden, 1)

    # Fused head: [ action_head | value_head | zero pad ] -> multiple of 128 lanes.
    head_w = max(128, ((action_dim + 1 + 127) // 128) * 128)
    wh = (jnp.zeros((hidden, head_w), jnp.float32)
          .at[:, :action_dim].set(wa)
          .at[:, action_dim:action_dim + 1].set(wv))
    bh = (jnp.zeros((1, head_w), jnp.float32)
          .at[:, :action_dim].set(ba)
          .at[:, action_dim:action_dim + 1].set(bv))

    # Additive softmax mask: 0 on real logit columns, -1e30 on padded/value cols.
    col = jnp.arange(head_w)
    mask = jnp.where(col < action_dim, 0.0, -1e30).astype(jnp.float32).reshape(1, head_w)
    # Value selector: 1.0 at the value column, 0 elsewhere.
    vsel = (col == action_dim).astype(jnp.float32).reshape(1, head_w)

    return {
        "w1": w1.astype(weight_dtype), "b1": b1,
        "w2": w2.astype(weight_dtype), "b2": b2,
        "wh": wh.astype(weight_dtype), "bh": bh,
        "mask": mask, "vsel": vsel,
    }


# Pure-JAX reference with the same dtype policy (bf16 weights, f32 accumulate),
# used only for the self-check in __main__.
def reference_forward(state, params, action_dim):
    wdt = params["w1"].dtype
    h1 = jnp.maximum(jnp.dot(state.astype(wdt), params["w1"],
                             preferred_element_type=jnp.float32) + params["b1"], 0.0)
    h2 = jnp.maximum(jnp.dot(h1.astype(wdt), params["w2"],
                             preferred_element_type=jnp.float32) + params["b2"], 0.0)
    head = jnp.dot(h2.astype(wdt), params["wh"],
                   preferred_element_type=jnp.float32) + params["bh"]
    probs = jax.nn.softmax(head[:, :action_dim], axis=-1)
    value = head[:, action_dim:action_dim + 1]
    return probs, value


if __name__ == "__main__":
    # Small env-like shapes (LunarLander-ish): obs_dim=8, action_dim=4.
    B, OBS_DIM, ACTION_DIM, HIDDEN = 2, 8, 4, 256

    key = jax.random.PRNGKey(0)
    k_params, k_state = jax.random.split(key)
    params = init_params(k_params, OBS_DIM, ACTION_DIM, HIDDEN)
    state = jax.random.normal(k_state, (B, OBS_DIM), jnp.float32)

    action_prob, state_value = policy_forward(state, params, ACTION_DIM)
    jax.block_until_ready((action_prob, state_value))

    # Sanity: shapes match the PyTorch module, rows sum to 1, matches JAX reference.
    assert action_prob.shape == (B, ACTION_DIM)
    assert state_value.shape == (B, 1)
    assert bool(jnp.all(jnp.isfinite(action_prob))) and bool(jnp.all(jnp.isfinite(state_value)))
    assert jnp.allclose(jnp.sum(action_prob, axis=-1), 1.0, atol=1e-5)

    ref_prob, ref_value = reference_forward(state, params, ACTION_DIM)
    assert jnp.allclose(action_prob, ref_prob, atol=2e-3)
    assert jnp.allclose(state_value, ref_value, atol=1e-3, rtol=1e-3)

    # Exercise the tiled (training-scale) path as well: multi-step grid.
    B2 = 600
    state2 = jax.random.normal(jax.random.PRNGKey(1), (B2, OBS_DIM), jnp.float32)
    p2, v2 = policy_forward(state2, params, ACTION_DIM, tile_b=256)
    jax.block_until_ready((p2, v2))
    rp2, rv2 = reference_forward(state2, params, ACTION_DIM)
    assert p2.shape == (B2, ACTION_DIM) and v2.shape == (B2, 1)
    assert jnp.allclose(p2, rp2, atol=2e-3)
    assert jnp.allclose(v2, rv2, atol=1e-3, rtol=1e-3)

    print("KERNEL_OK")
</pallas_src>

<mosaic_0001>
module attributes {stable_mosaic.version = 11 : i64} {
  func.func @policy_kernel(%arg0: i32, %arg1: memref<8x8xf32, #tpu.memory_space<vmem>>, %arg2: memref<8x256xbf16, #tpu.memory_space<vmem>>, %arg3: memref<1x256xf32, #tpu.memory_space<vmem>>, %arg4: memref<256x256xbf16, #tpu.memory_space<vmem>>, %arg5: memref<1x256xf32, #tpu.memory_space<vmem>>, %arg6: memref<256x128xbf16, #tpu.memory_space<vmem>>, %arg7: memref<1x128xf32, #tpu.memory_space<vmem>>, %arg8: memref<1x128xf32, #tpu.memory_space<vmem>>, %arg9: memref<1x128xf32, #tpu.memory_space<vmem>>, %arg10: memref<8x128xf32, #tpu.memory_space<vmem>>) attributes {dimension_semantics = [#tpu.dimension_semantics<parallel>], iteration_bounds = array<i64: 1>, scalar_prefetch = 0 : i64, scratch_operands = 0 : i64, tpu.core_type = #tpu.core_type<tc>, window_params = [{transform_indices = @transform_0, window_bounds = array<i64: 8, 8>}, {pipeline_mode = #tpu.pipeline_mode<synchronous>, transform_indices = @transform_1, window_bounds = array<i64: 8, 256>}, {pipeline_mode = #tpu.pipeline_mode<synchronous>, transform_indices = @transform_2, window_bounds = array<i64: 1, 256>}, {pipeline_mode = #tpu.pipeline_mode<synchronous>, transform_indices = @transform_3, window_bounds = array<i64: 256, 256>}, {pipeline_mode = #tpu.pipeline_mode<synchronous>, transform_indices = @transform_4, window_bounds = array<i64: 1, 256>}, {pipeline_mode = #tpu.pipeline_mode<synchronous>, transform_indices = @transform_5, window_bounds = array<i64: 256, 128>}, {pipeline_mode = #tpu.pipeline_mode<synchronous>, transform_indices = @transform_6, window_bounds = array<i64: 1, 128>}, {pipeline_mode = #tpu.pipeline_mode<synchronous>, transform_indices = @transform_7, window_bounds = array<i64: 1, 128>}, {pipeline_mode = #tpu.pipeline_mode<synchronous>, transform_indices = @transform_8, window_bounds = array<i64: 1, 128>}, {transform_indices = @transform_9, window_bounds = array<i64: 8, 128>}]} {
    %c0 = arith.constant 0 : index
    %c0_0 = arith.constant 0 : index
    %0 = vector.load %arg1[%c0, %c0_0] : memref<8x8xf32, #tpu.memory_space<vmem>>, vector<8x8xf32>
    %1 = arith.truncf %0 : vector<8x8xf32> to vector<8x8xbf16>
    %c0_1 = arith.constant 0 : index
    %c0_2 = arith.constant 0 : index
    %2 = vector.load %arg2[%c0_1, %c0_2] : memref<8x256xbf16, #tpu.memory_space<vmem>>, vector<8x256xbf16>
    %cst = arith.constant dense<0.000000e+00> : vector<8x256xf32>
    %3 = tpu.matmul %1, %2, %cst {dimension_numbers = #tpu.dot_dimension_numbers<[1], [0], [0], [1], [0, 0, 1, 1], [], []>} : vector<8x8xbf16>, vector<8x256xbf16>, vector<8x256xf32> -> vector<8x256xf32>
    %c0_3 = arith.constant 0 : index
    %c0_4 = arith.constant 0 : index
    %4 = vector.load %arg3[%c0_3, %c0_4] : memref<1x256xf32, #tpu.memory_space<vmem>>, vector<1x256xf32>
    %5 = vector.broadcast %4 : vector<1x256xf32> to vector<8x256xf32>
    %6 = arith.addf %3, %5 : vector<8x256xf32>
    %cst_5 = arith.constant 0.000000e+00 : f32
    %7 = vector.broadcast %cst_5 : f32 to vector<8x256xf32>
    %8 = arith.maximumf %6, %7 : vector<8x256xf32>
    %9 = arith.truncf %8 : vector<8x256xf32> to vector<8x256xbf16>
    %c0_6 = arith.constant 0 : index
    %c0_7 = arith.constant 0 : index
    %10 = vector.load %arg4[%c0_6, %c0_7] : memref<256x256xbf16, #tpu.memory_space<vmem>>, vector<256x256xbf16>
    %cst_8 = arith.constant dense<0.000000e+00> : vector<8x256xf32>
    %11 = tpu.matmul %9, %10, %cst_8 {dimension_numbers = #tpu.dot_dimension_numbers<[1], [0], [0], [1], [0, 0, 1, 1], [], []>} : vector<8x256xbf16>, vector<256x256xbf16>, vector<8x256xf32> -> vector<8x256xf32>
    %c0_9 = arith.constant 0 : index
    %c0_10 = arith.constant 0 : index
    %12 = vector.load %arg5[%c0_9, %c0_10] : memref<1x256xf32, #tpu.memory_space<vmem>>, vector<1x256xf32>
    %13 = vector.broadcast %12 : vector<1x256xf32> to vector<8x256xf32>
    %14 = arith.addf %11, %13 : vector<8x256xf32>
    %cst_11 = arith.constant 0.000000e+00 : f32
    %15 = vector.broadcast %cst_11 : f32 to vector<8x256xf32>
    %16 = arith.maximumf %14, %15 : vector<8x256xf32>
    %17 = arith.truncf %16 : vector<8x256xf32> to vector<8x256xbf16>
    %c0_12 = arith.constant 0 : index
    %c0_13 = arith.constant 0 : index
    %18 = vector.load %arg6[%c0_12, %c0_13] : memref<256x128xbf16, #tpu.memory_space<vmem>>, vector<256x128xbf16>
    %cst_14 = arith.constant dense<0.000000e+00> : vector<8x128xf32>
    %19 = tpu.matmul %17, %18, %cst_14 {dimension_numbers = #tpu.dot_dimension_numbers<[1], [0], [0], [1], [0, 0, 1, 1], [], []>} : vector<8x256xbf16>, vector<256x128xbf16>, vector<8x128xf32> -> vector<8x128xf32>
    %c0_15 = arith.constant 0 : index
    %c0_16 = arith.constant 0 : index
    %20 = vector.load %arg7[%c0_15, %c0_16] : memref<1x128xf32, #tpu.memory_space<vmem>>, vector<1x128xf32>
    %21 = vector.broadcast %20 : vector<1x128xf32> to vector<8x128xf32>
    %22 = arith.addf %19, %21 : vector<8x128xf32>
    %c0_17 = arith.constant 0 : index
    %c0_18 = arith.constant 0 : index
    %23 = vector.load %arg8[%c0_17, %c0_18] : memref<1x128xf32, #tpu.memory_space<vmem>>, vector<1x128xf32>
    %24 = vector.broadcast %23 : vector<1x128xf32> to vector<8x128xf32>
    %25 = arith.addf %22, %24 : vector<8x128xf32>
    %cst_19 = arith.constant dense<0xFF800000> : vector<8xf32>
    %26 = vector.multi_reduction <maximumf>, %25, %cst_19 [1] : vector<8x128xf32> to vector<8xf32>
    %27 = vector.shape_cast %26 : vector<8xf32> to vector<8x1xf32>
    %28 = vector.broadcast %27 : vector<8x1xf32> to vector<8x128xf32>
    %29 = arith.subf %25, %28 : vector<8x128xf32>
    %30 = math.exp %29 : vector<8x128xf32>
    %cst_20 = arith.constant dense<0.000000e+00> : vector<8xf32>
    %31 = vector.multi_reduction <add>, %30, %cst_20 [1] : vector<8x128xf32> to vector<8xf32>
    %32 = vector.shape_cast %31 : vector<8xf32> to vector<8x1xf32>
    %33 = vector.broadcast %32 : vector<8x1xf32> to vector<8x128xf32>
    %34 = arith.divf %30, %33 : vector<8x128xf32>
    %c0_21 = arith.constant 0 : index
    %c0_22 = arith.constant 0 : index
    %35 = vector.load %arg9[%c0_21, %c0_22] : memref<1x128xf32, #tpu.memory_space<vmem>>, vector<1x128xf32>
    %36 = vector.broadcast %35 : vector<1x128xf32> to vector<8x128xf32>
    %37 = arith.mulf %22, %36 : vector<8x128xf32>
    %38 = arith.addf %34, %37 : vector<8x128xf32>
    %c0_23 = arith.constant 0 : index
    %c0_24 = arith.constant 0 : index
    %39 = vector.load %arg10[%c0_23, %c0_24] : memref<8x128xf32, #tpu.memory_space<vmem>>, vector<8x128xf32>
    tpu.vector_store %arg10[%c0_23, %c0_24], %38 {strides = array<i32>} : memref<8x128xf32, #tpu.memory_space<vmem>>, vector<8x128xf32>,
    return
  }
  func.func @transform_0(%arg0: i32) -> (i32, i32) {
    %c0_i32 = arith.constant 0 : i32
    %c0_i32_0 = arith.constant 0 : i32
    return %arg0, %c0_i32 : i32, i32
  }
  func.func @transform_1(%arg0: i32) -> (i32, i32) {
    %c0_i32 = arith.constant 0 : i32
    %c0_i32_0 = arith.constant 0 : i32
    %c0_i32_1 = arith.constant 0 : i32
    return %c0_i32, %c0_i32_0 : i32, i32
  }
  func.func @transform_2(%arg0: i32) -> (i32, i32) {
    %c0_i32 = arith.constant 0 : i32
    %c0_i32_0 = arith.constant 0 : i32
    %c0_i32_1 = arith.constant 0 : i32
    return %c0_i32, %c0_i32_0 : i32, i32
  }
  func.func @transform_3(%arg0: i32) -> (i32, i32) {
    %c0_i32 = arith.constant 0 : i32
    %c0_i32_0 = arith.constant 0 : i32
    %c0_i32_1 = arith.constant 0 : i32
    return %c0_i32, %c0_i32_0 : i32, i32
  }
  func.func @transform_4(%arg0: i32) -> (i32, i32) {
    %c0_i32 = arith.constant 0 : i32
    %c0_i32_0 = arith.constant 0 : i32
    %c0_i32_1 = arith.constant 0 : i32
    return %c0_i32, %c0_i32_0 : i32, i32
  }
  func.func @transform_5(%arg0: i32) -> (i32, i32) {
    %c0_i32 = arith.constant 0 : i32
    %c0_i32_0 = arith.constant 0 : i32
    %c0_i32_1 = arith.constant 0 : i32
    return %c0_i32, %c0_i32_0 : i32, i32
  }
  func.func @transform_6(%arg0: i32) -> (i32, i32) {
    %c0_i32 = arith.constant 0 : i32
    %c0_i32_0 = arith.constant 0 : i32
    %c0_i32_1 = arith.constant 0 : i32
    return %c0_i32, %c0_i32_0 : i32, i32
  }
  func.func @transform_7(%arg0: i32) -> (i32, i32) {
    %c0_i32 = arith.constant 0 : i32
    %c0_i32_0 = arith.constant 0 : i32
    %c0_i32_1 = arith.constant 0 : i32
    return %c0_i32, %c0_i32_0 : i32, i32
  }
  func.func @transform_8(%arg0: i32) -> (i32, i32) {
    %c0_i32 = arith.constant 0 : i32
    %c0_i32_0 = arith.constant 0 : i32
    %c0_i32_1 = arith.constant 0 : i32
    return %c0_i32, %c0_i32_0 : i32, i32
  }
  func.func @transform_9(%arg0: i32) -> (i32, i32) {
    %c0_i32 = arith.constant 0 : i32
    %c0_i32_0 = arith.constant 0 : i32
    return %arg0, %c0_i32 : i32, i32
  }
}

</mosaic_0001>

<bundles_post_ra>
// kernel: tpu_custom_call.1
= control target key start
LH: loop header
LB: loop body
LE: loop exit
PB: predicated region body
PF: predicated region fallthrough
CT: control target
= control target key end

     0   :  { %14 = vsyncpa [#allocation3], 0  ;;  %s1131_s0 = inlined_call_operand.hbm [shape: f32[8,8], index: 0, kind: input, shape index: {}]   ;;  %s1132_s1 = inlined_call_operand.hbm [shape: bf16[8,256], index: 1, kind: input, shape index: {}]   ;;  %s1133_s2 = inlined_call_operand.hbm [shape: f32[1,256], index: 2, kind: input, shape index: {}]   ;;  %s1134_s3 = inlined_call_operand.hbm [shape: bf16[256,256], index: 3, kind: input, shape index: {}]   ;;  %s1135_s4 = inlined_call_operand.vmem [shape: f32[1,256], index: 4, kind: input, shape index: {}]   ;;  %s1136_s5 = inlined_call_operand.hbm [shape: bf16[256,128], index: 5, kind: input, shape index: {}]   ;;  %s1137_s6 = inlined_call_operand.vmem [shape: f32[1,128], index: 6, kind: input, shape index: {}]   ;;  %s1138_s7 = inlined_call_operand.vmem [shape: f32[1,128], index: 7, kind: input, shape index: {}]   ;;  %s1139_s8 = inlined_call_operand.vmem [shape: f32[1,128], index: 8, kind: input, shape index: {}]   ;;  %s1140_s9 = inlined_call_operand.hbm [shape: f32[8,128], index: 9, kind: output, shape index: {}]  }
   0x1   :  { %15 = vsyncpa [#allocation6], 0 }
   0x2   :  { %16 = vsyncpa [#allocation9], 0  ;;  %s34_s11 = sshll.u32 %s1132_s1, 4  ;;  %s35_s11 = int_to_ptr.hbm [resolvable:$true] %s34_s11 }
   0x3   :  { %17 = vsyncpa [#allocation4], 0  ;;  %s1037_s12 = smov [#allocation5]   ;;  %s55_s16 = sshll.u32 %s1134_s3, 4  ;;  %s56_s16 = int_to_ptr.hbm [resolvable:$true] %s55_s16 }
   0x4   :  { %s36_s13 = sshll.u32 %s1037_s12, 4  ;;  %s1038_s17 = smov [#allocation8]   ;;  %s37_s13 = int_to_ptr.vmem [resolvable:$true] %s36_s13 }
   0x5   :  { %39 = dma.hbm_to_vmem [thread:$0]  %s35_s11, 128, %s37_s13, [#allocation6]  }
   0x6   :  { %s57_s18 = sshll.u32 %s1038_s17, 4  ;;  %s1039_s19 = smov 128   ;;  %s58_s18 = int_to_ptr.vmem [resolvable:$true] %s57_s18 }
   0x7   :  { %s1040_s20 = smov 8   ;;  %s23_s1 = sshll.u32 %s1131_s0, 4  ;;  %s24_s1 = int_to_ptr.hbm [resolvable:$true] %s23_s1 }
   0x8   :  { %63 = dma.hbm_to_vmem [thread:$0]  %s56_s16, 4096, %s58_s18, [#allocation9], %s1039_s19, %s1039_s19, %s1040_s20  }
   0x9   :  { %s1041_s23 = smov [#allocation2]   ;;  %s45_s3 = sshll.u32 %s1133_s2, 4  ;;  %s46_s3 = int_to_ptr.hbm [resolvable:$true] %s45_s3 }
   0xa   :  { %s25_s24 = sshll.u32 %s1041_s23, 4  ;;  %s1042_s27 = smov [#allocation7]   ;;  %s26_s24 = int_to_ptr.vmem [resolvable:$true] %s25_s24 }
   0xb   :  { %28 = dma.hbm_to_vmem [thread:$0]  %s24_s1, 128, %s26_s24, [#allocation3]  }
   0xc   :  { %s47_s28 = sshll.u32 %s1042_s27, 4  ;;  %s70_s10 = sshll.u32 %s1136_s5, 4  ;;  %s48_s28 = int_to_ptr.vmem [resolvable:$true] %s47_s28  ;;  %s71_s10 = int_to_ptr.hbm [resolvable:$true] %s70_s10 }
   0xd   :  { %50 = dma.hbm_to_vmem [thread:$0]  %s46_s3, 32, %s48_s28, [#allocation6]  }
   0xe   :  { %s1043_s0 = smov [#allocation10]   ;;  %s1044_s12 = smov 64  }
   0xf   :  { %s72_s11 = sshll.u32 %s1043_s0, 4  ;;  %s1045_s13 = smov 4   ;;  %s73_s11 = int_to_ptr.vmem [resolvable:$true] %s72_s11 }
  0x10   :  { %78 = dma.hbm_to_vmem [thread:$0]  %s71_s10, 2048, %s73_s11, [#allocation9], %s1044_s12, %s1044_s12, %s1045_s13  }
  0x11   :  { %1029 = dma.done.wait [#allocation3], 128  }
  0x12   :  { %1030 = vsyncadd [#allocation3], 4294967168 }
  0x13   :  { %1031 = dma.done.wait [#allocation6], 160  }
  0x14   :  { %1032 = vsyncadd [#allocation6], 4294967136 }
  0x15   :  { %1033 = dma.done.wait [#allocation9], 6144  }
  0x16   :  { %1034 = vsyncadd [#allocation9], 4294961152  ;;  %v108_v0 = vld [vmem:[#allocation5] sm:$0xff]  ;;  %vm124_vm0 = vcmask 1043456   ;;  %v106_v1 = vld [vmem:[#allocation2] sm:$0xff]  ;;  %vm120_vm1 = vcmask 64512  }
  0x17   :  { %v686_v2 = vld [vmem:[#allocation8 + $0x70] sm:$0xf]  ;;  %v116_v3 = vunpack.c.l.b16 %v108_v0  ;;  %v117_v4 = vunpack.c.h.b16 %v108_v0  ;;  %v835_v5 = vld [vmem:[#allocation8 + $0x74] sm:$0xf0]  ;;  %v834_v10 = vld [vmem:[#allocation8 + $0x74] sm:$0xf]  ;;  %v107_v26 = vpack.c.bf16 %v106_v1, %v106_v1 }
  0x18   :  { %v750_v6 = vld [vmem:[#allocation8 + $0xf0] sm:$0xf]  ;;  %v851_v7 = vld [vmem:[#allocation8 + $0xf4] sm:$0xf0]  ;;  %v687_v8 = vor.u32 %v835_v5, %v686_v2  ;;  %v688_v11 = vld [vmem:[#allocation8 + $0x78] sm:$0xf0] }
  0x19   :  { %v751_v9 = vor.u32 %v851_v7, %v750_v6  ;;  %v850_v12 = vld [vmem:[#allocation8 + $0xf4] sm:$0xf]  ;;  %v118_v13 = vpack.c.b16 %v116_v3, %v116_v3  ;;  %v119_v14 = vpack.c.b16 %v117_v4, %v117_v4  ;;  %v691_v15 = vor.u32 %v834_v10, %v688_v11  ;;  %v752_v16 = vld [vmem:[#allocation8 + $0xf8] sm:$0xf0]  ;;  %v678_v17 = vld [vmem:[#allocation8 + $0x60] sm:$0xf] }
  0x1a   :  { %v833_v18 = vld [vmem:[#allocation8 + $0x64] sm:$0xf0]  ;;  %359 = vmatpush.bf16.msra.mxu2 %v687_v8  ;;  %v755_v19 = vor.u32 %v850_v12, %v752_v16  ;;  %v742_v21 = vld [vmem:[#allocation8 + $0xe0] sm:$0xf]  ;;  %v832_v23 = vld [vmem:[#allocation8 + $0x64] sm:$0xf] }
  0x1b   :  { %372 = vmatpush.bf16.msra.mxu3 %v751_v9  ;;  %v679_v20 = vor.u32 %v833_v18, %v678_v17  ;;  %v849_v22 = vld [vmem:[#allocation8 + $0xe4] sm:$0xf0]  ;;  %v126_v24 = vsel %vm124_vm0, %v118_v13, 0  ;;  %v129_v25 = vsel %vm124_vm0, %v119_v14, 0  ;;  %v680_v28 = vld [vmem:[#allocation8 + $0x68] sm:$0xf0] }
  0x1c   :  { %v743_v27 = vor.u32 %v849_v22, %v742_v21  ;;  %v848_v29 = vld [vmem:[#allocation8 + $0xe4] sm:$0xf]  ;;  %138 = vmatpush.bf16.msra.mxu0 %v126_v24  ;;  %151 = vmatpush.bf16.msra.mxu1 %v129_v25  ;;  %v744_v30 = vld [vmem:[#allocation8 + $0xe8] sm:$0xf0]  ;;  %v670_v31 = vld [vmem:[#allocation8 + $0x50] sm:$0xf]  ;;  %v683_v33 = vor.u32 %v832_v23, %v680_v28 }
  0x1d   :  { %v831_v32 = vld [vmem:[#allocation8 + $0x54] sm:$0xf0]  ;;  %v747_v34 = vor.u32 %v848_v29, %v744_v30  ;;  %v734_v35 = vld [vmem:[#allocation8 + $0xd0] sm:$0xf]  ;;  %v830_v37 = vld [vmem:[#allocation8 + $0x54] sm:$0xf] }
  0x1e   :  { %v847_v36 = vld [vmem:[#allocation8 + $0xd4] sm:$0xf0]  ;;  %360 = vmatpush.bf16.msra.mxu2 %v679_v20  ;;  %v671_v38 = vor.u32 %v831_v32, %v670_v31  ;;  %v672_v40 = vld [vmem:[#allocation8 + $0x58] sm:$0xf0]  ;;  %v846_v41 = vld [vmem:[#allocation8 + $0xd4] sm:$0xf] }
  0x1f   :  { %373 = vmatpush.bf16.msra.mxu3 %v743_v27  ;;  %v735_v39 = vor.u32 %v847_v36, %v734_v35  ;;  %v736_v42 = vld [vmem:[#allocation8 + $0xd8] sm:$0xf0]  ;;  %626 = vmatmul.msk.bf16.vlgmr.msra.gmra.mxu0 %vm120_vm1, %v107_v26  ;;  %v662_v43 = vld [vmem:[#allocation8 + $0x40] sm:$0xf]  ;;  %v829_v44 = vld [vmem:[#allocation8 + $0x44] sm:$0xf0]  ;;  %v675_v47 = vor.u32 %v830_v37, %v672_v40 }
  0x20   :  { %385 = vmatpush.bf16.msrb.mxu0 %v691_v15  ;;  %398 = vmatpush.bf16.msrb.mxu1 %v755_v19  ;;  %v726_v45 = vld [vmem:[#allocation8 + $0xc0] sm:$0xf]  ;;  %v845_v46 = vld [vmem:[#allocation8 + $0xc4] sm:$0xf0]  ;;  %v739_v48 = vor.u32 %v846_v41, %v736_v42  ;;  %v828_v49 = vld [vmem:[#allocation8 + $0x44] sm:$0xf]  ;;  %v663_v51 = vor.u32 %v829_v44, %v662_v43 }
  0x21   :  { %627 = vmatmul.msk.bf16.vlgmr.msra.gmra.mxu1 %vm120_vm1, %v107_v26  ;;  %v664_v50 = vld [vmem:[#allocation8 + $0x48] sm:$0xf0]  ;;  %v727_v52 = vor.u32 %v845_v46, %v726_v45  ;;  %v844_v53 = vld [vmem:[#allocation8 + $0xc4] sm:$0xf]  ;;  %v654_v55 = vld [vmem:[#allocation8 + $0x30] sm:$0xf] }
  0x22   :  { %361 = vmatpush.bf16.msra.mxu2 %v671_v38  ;;  %v728_v54 = vld [vmem:[#allocation8 + $0xc8] sm:$0xf0]  ;;  %v827_v56 = vld [vmem:[#allocation8 + $0x34] sm:$0xf0]  ;;  %v718_v57 = vld [vmem:[#allocation8 + $0xb0] sm:$0xf]  ;;  %v667_v60 = vor.u32 %v828_v49, %v664_v50 }
  0x23   :  { %374 = vmatpush.bf16.msra.mxu3 %v735_v39  ;;  %v843_v58 = vld [vmem:[#allocation8 + $0xb4] sm:$0xf0]  ;;  %v826_v59 = vld [vmem:[#allocation8 + $0x34] sm:$0xf]  ;;  %v731_v61 = vor.u32 %v844_v53, %v728_v54  ;;  %v656_v62 = vld [vmem:[#allocation8 + $0x38] sm:$0xf0]  ;;  %v655_v1 = vor.u32 %v827_v56, %v654_v55 }
  0x24   :  { %386 = vmatpush.bf16.msrb.mxu0 %v683_v33  ;;  %399 = vmatpush.bf16.msrb.mxu1 %v747_v34  ;;  %v842_v63 = vld [vmem:[#allocation8 + $0xb4] sm:$0xf]  ;;  %v720_v0 = vld [vmem:[#allocation8 + $0xb8] sm:$0xf0]  ;;  %v719_v2 = vor.u32 %v843_v58, %v718_v57  ;;  %v646_v3 = vld [vmem:[#allocation8 + $0x20] sm:$0xf]  ;;  %v659_v7 = vor.u32 %v826_v59, %v656_v62 }
  0x25   :  { %v825_v4 = vld [vmem:[#allocation8 + $0x24] sm:$0xf0]  ;;  %v710_v5 = vld [vmem:[#allocation8 + $0xa0] sm:$0xf]  ;;  %v723_v8 = vor.u32 %v842_v63, %v720_v0  ;;  %v824_v9 = vld [vmem:[#allocation8 + $0x24] sm:$0xf] }
  0x26   :  { %362 = vmatpush.bf16.msra.mxu2 %v663_v51  ;;  %v841_v6 = vld [vmem:[#allocation8 + $0xa4] sm:$0xf0]  ;;  %v647_v10 = vor.u32 %v825_v4, %v646_v3  ;;  %v648_v12 = vld [vmem:[#allocation8 + $0x28] sm:$0xf0]  ;;  %v840_v13 = vld [vmem:[#allocation8 + $0xa4] sm:$0xf] }
  0x27   :  { %375 = vmatpush.bf16.msra.mxu3 %v727_v52  ;;  %v711_v11 = vor.u32 %v841_v6, %v710_v5  ;;  %v712_v14 = vld [vmem:[#allocation8 + $0xa8] sm:$0xf0]  ;;  %v651_v15 = vor.u32 %v824_v9, %v648_v12  ;;  %v638_v17 = vld [vmem:[#allocation8 + $0x10] sm:$0xf]  ;;  %v823_v18 = vld [vmem:[#allocation8 + $0x14] sm:$0xf0] }
  0x28   :  { %387 = vmatpush.bf16.msrb.mxu0 %v675_v47  ;;  %400 = vmatpush.bf16.msrb.mxu1 %v739_v48  ;;  %v715_v16 = vor.u32 %v840_v13, %v712_v14  ;;  %v702_v19 = vld [vmem:[#allocation8 + $0x90] sm:$0xf]  ;;  %v639_v20 = vor.u32 %v823_v18, %v638_v17  ;;  %v839_v21 = vld [vmem:[#allocation8 + $0x94] sm:$0xf0]  ;;  %v822_v22 = vld [vmem:[#allocation8 + $0x14] sm:$0xf] }
  0x29   :  { %v640_v23 = vld [vmem:[#allocation8 + $0x18] sm:$0xf0]  ;;  %v703_v24 = vor.u32 %v839_v21, %v702_v19  ;;  %v838_v26 = vld [vmem:[#allocation8 + $0x94] sm:$0xf]  ;;  %v630_v29 = vld [vmem:[#allocation8] sm:$0xf] }
  0x2a   :  { %363 = vmatpush.bf16.msra.mxu2 %v655_v1  ;;  %v643_v25 = vor.u32 %v822_v22, %v640_v23  ;;  %v704_v27 = vld [vmem:[#allocation8 + $0x98] sm:$0xf0]  ;;  %v821_v30 = vld [vmem:[#allocation8 + $0x4] sm:$0xf0]  ;;  %v694_v31 = vld [vmem:[#allocation8 + $0x80] sm:$0xf] }
  0x2b   :  { %376 = vmatpush.bf16.msra.mxu3 %v719_v2  ;;  %v707_v28 = vor.u32 %v838_v26, %v704_v27  ;;  %v631_v32 = vor.u32 %v821_v30, %v630_v29  ;;  %v837_v33 = vld [vmem:[#allocation8 + $0x84] sm:$0xf0]  ;;  %v820_v34 = vld [vmem:[#allocation8 + $0x4] sm:$0xf]  ;;  %v632_v35 = vld [vmem:[#allocation8 + $0x8] sm:$0xf0] }
  0x2c   :  { %388 = vmatpush.bf16.msrb.mxu0 %v667_v60  ;;  %401 = vmatpush.bf16.msrb.mxu1 %v731_v61  ;;  %v695_v36 = vor.u32 %v837_v33, %v694_v31  ;;  %v635_v37 = vor.u32 %v820_v34, %v632_v35  ;;  %v836_v38 = vld [vmem:[#allocation8 + $0x84] sm:$0xf]  ;;  %v696_v39 = vld [vmem:[#allocation8 + $0x88] sm:$0xf0]  ;;  %v867_v41 = vld [vmem:[#allocation10 + $0x78] sm:$0xff]  ;;  %s1046_s17 = smov [#allocation11]  }
  0x2d   :  { %v699_v40 = vor.u32 %v836_v38, %v696_v39  ;;  %v859_v42 = vld [vmem:[#allocation10 + $0x38] sm:$0xff]  ;;  %v866_v43 = vld [vmem:[#allocation10 + $0x70] sm:$0xff]  ;;  %v865_v45 = vld [vmem:[#allocation10 + $0x68] sm:$0xff]  ;;  %s612_s18 = sshll.u32 %s1046_s17, 4  ;;  %s614_s21 = sshll.u32 %s1140_s9, 4  ;;  %s613_s18 = int_to_ptr.vmem [resolvable:$true] %s612_s18  ;;  %s615_s21 = int_to_ptr.hbm [resolvable:$true] %s614_s21 }
  0x2e   :  { %364 = vmatpush.bf16.msra.mxu2 %v647_v10  ;;  %v858_v44 = vld [vmem:[#allocation10 + $0x30] sm:$0xff]  ;;  %v857_v46 = vld [vmem:[#allocation10 + $0x28] sm:$0xff]  ;;  %v864_v47 = vld [vmem:[#allocation10 + $0x60] sm:$0xff] }
  0x2f   :  { %377 = vmatpush.bf16.msra.mxu3 %v711_v11  ;;  %v856_v48 = vld [vmem:[#allocation10 + $0x20] sm:$0xff]  ;;  %v863_v49 = vld [vmem:[#allocation10 + $0x58] sm:$0xff]  ;;  %v862_v51 = vld [vmem:[#allocation10 + $0x50] sm:$0xff] }
  0x30   :  { %389 = vmatpush.bf16.msrb.mxu0 %v659_v7  ;;  %402 = vmatpush.bf16.msrb.mxu1 %v723_v8  ;;  %v109_v50 = vld [vmem:[#allocation7] sm:$0x3]  ;;  %v861_v1 = vld [vmem:[#allocation10 + $0x48] sm:$0xff]  ;;  %v854_v2 = vld [vmem:[#allocation10 + $0x10] sm:$0xff] }
  0x31   :  { %v111_v52 = vperm.slane %v109_v50, 0  ;;  %v112_v53 = vperm.slane %v109_v50, 1  ;;  %v855_v0 = vld [vmem:[#allocation10 + $0x18] sm:$0xff]  ;;  %v860_v3 = vld [vmem:[#allocation10 + $0x40] sm:$0xff]  ;;  %v853_v4 = vld [vmem:[#allocation10 + $0x8] sm:$0xff] }
  0x32   :  { %365 = vmatpush.bf16.msra.mxu2 %v639_v20  ;;  %v852_v5 = vld [vmem:[#allocation10] sm:$0xff]  ;;  %v193_v6 = vld [vmem:[%s1135_s4] sm:$0x3] }
  0x33   :  { %378 = vmatpush.bf16.msra.mxu3 %v703_v24  ;;  %v196_v7 = vperm.slane %v193_v6, 1  ;;  %v195_v11 = vperm.slane %v193_v6, 0  ;;  %v878_v26 = vld [vmem:[%s1137_s6] ss:$0 sm:$0xff] }
  0x34   :  { %390 = vmatpush.bf16.msrb.mxu0 %v651_v15  ;;  %403 = vmatpush.bf16.msrb.mxu1 %v715_v16  ;;  %v880_v29 = vld [vmem:[%s1138_s7] ss:$0 sm:$0xff] }
  0x36   :  { %366 = vmatpush.bf16.msra.mxu2 %v631_v32 }
  0x37   :  { %379 = vmatpush.bf16.msra.mxu3 %v695_v36 }
  0x38   :  { %391 = vmatpush.bf16.msrb.mxu0 %v643_v25  ;;  %404 = vmatpush.bf16.msrb.mxu1 %v707_v28 }
  0x3a   :  { %547 = vmatpush.bf16.msrb.mxu2 %v859_v42 }
  0x3b   :  { %560 = vmatpush.bf16.msrb.mxu3 %v867_v41 }
  0x3c   :  { %392 = vmatpush.bf16.msrb.mxu0 %v635_v37  ;;  %405 = vmatpush.bf16.msrb.mxu1 %v699_v40 }
  0x3e   :  { %548 = vmatpush.bf16.msrb.mxu2 %v858_v44 }
  0x3f   :  { %561 = vmatpush.bf16.msrb.mxu3 %v866_v43 }
  0x42   :  { %549 = vmatpush.bf16.msrb.mxu2 %v857_v46 }
  0x43   :  { %562 = vmatpush.bf16.msrb.mxu3 %v865_v45  ;;  %v879_v45 = vld [vmem:[%s1139_s8] ss:$0 sm:$0xff] }
  0x46   :  { %550 = vmatpush.bf16.msrb.mxu2 %v856_v48 }
  0x47   :  { %563 = vmatpush.bf16.msrb.mxu3 %v864_v47 }
  0x4a   :  { %551 = vmatpush.bf16.msrb.mxu2 %v855_v0 }
  0x4b   :  { %564 = vmatpush.bf16.msrb.mxu3 %v863_v49 }
  0x4e   :  { %552 = vmatpush.bf16.msrb.mxu2 %v854_v2 }
  0x4f   :  { %565 = vmatpush.bf16.msrb.mxu3 %v862_v51 }
  0x52   :  { %553 = vmatpush.bf16.msrb.mxu2 %v853_v4 }
  0x53   :  { %566 = vmatpush.bf16.msrb.mxu3 %v861_v1 }
  0x56   :  { %554 = vmatpush.bf16.msrb.mxu2 %v852_v5 }
  0x57   :  { %567 = vmatpush.bf16.msrb.mxu3 %v860_v3 }
  0x9c   :  { %v140_v54 = vpop.f32.mrf.mxu0 }
  0x9d   :  { %v141_v56 = vadd.f32 %v140_v54, %v111_v52 }
  0x9e   :  { %v153_v55 = vpop.f32.mrf.mxu1 }
  0x9f   :  { %v154_v57 = vadd.f32 %v153_v55, %v112_v53  ;;  %v157_v58 = vmax.f32 %v141_v56, 0.0 }
  0xa1   :  { %v158_v59 = vmax.f32 %v154_v57, 0.0  ;;  %v159_v60 = vpack.c.bf16 %v157_v58, %v157_v58 }
  0xa3   :  { %v160_v61 = vpack.c.bf16 %v158_v59, %v158_v59  ;;  %367 = vmatmul.bf16.vlgmr.msra.gmra.mxu2 %v159_v60  ;;  %393 = vmatmul.bf16.vlgmr.msrb.gmra.mxu0 %v159_v60 }
  0xa4   :  { %v142_v62 = vpop.f32.mrf.mxu0 }
  0xa5   :  { %380 = vmatmul.bf16.vlgmr.msra.gmra.mxu3 %v160_v61  ;;  %406 = vmatmul.bf16.vlgmr.msrb.gmra.mxu1 %v160_v61 }
  0xa6   :  { %v155_v63 = vpop.f32.mrf.mxu1 }
 0x120   :  { %v394_v8 = vpop.f32.mrf.mxu0 }
 0x121   :  { %v395_v10 = vadd.f32 %v394_v8, %v196_v7 }
 0x122   :  { %v407_v9 = vpop.f32.mrf.mxu1 }
 0x123   :  { %v408_v12 = vadd.f32 %v407_v9, %v395_v10 }
 0x125   :  { %v412_v13 = vmax.f32 %v408_v12, 0.0 }
 0x126   :  { %v368_v14 = vpop.f32.mrf.mxu2 }
 0x127   :  { %v369_v16 = vadd.f32 %v368_v14, %v195_v11  ;;  %v414_v17 = vpack.c.bf16 %v412_v13, %v412_v13 }
 0x128   :  { %v381_v15 = vpop.f32.mrf.mxu3  ;;  %v396_v19 = vpop.f32.mrf.mxu0 }
 0x129   :  { %v382_v18 = vadd.f32 %v381_v15, %v369_v16  ;;  %568 = vmatmul.bf16.vlgmr.msrb.gmra.mxu3 %v414_v17 }
 0x12a   :  { %v409_v20 = vpop.f32.mrf.mxu1 }
 0x12b   :  { %v411_v21 = vmax.f32 %v382_v18, 0.0 }
 0x12d   :  { %v413_v22 = vpack.c.bf16 %v411_v21, %v411_v21 }
 0x12e   :  { %v370_v23 = vpop.f32.mrf.mxu2 }
 0x12f   :  { %555 = vmatmul.bf16.vlgmr.msrb.gmra.mxu2 %v413_v22 }
 0x130   :  { %v383_v24 = vpop.f32.mrf.mxu3 }
 0x1ac   :  { %v569_v25 = vpop.f32.mrf.mxu3 }
 0x1b2   :  { %v556_v27 = vpop.f32.mrf.mxu2 }
 0x1b3   :  { %v557_v28 = vadd.f32 %v878_v26, %v556_v27 }
 0x1b4   :  { %v571_v31 = vpop.f32.mrf.mxu3 }
 0x1b5   :  { %v570_v30 = vadd.f32 %v569_v25, %v557_v28 }
 0x1b7   :  { %v577_v32 = vadd.f32 %v880_v29, %v570_v30  ;;  %v604_v50 = vmul.f32 %v879_v45, %v570_v30 }
 0x1b9   :  { %578 = vmax.xlane.f32.xlu0 %v577_v32 }
 0x1ba   :  { %v558_v33 = vpop.f32.mrf.mxu2 }
 0x22c   :  { %v579_v34 = vpop.xlane.xlu0 %578 }
 0x22d   :  { %v580_v35 = vsub.f32 %v577_v32, %v579_v34 }
 0x22f   :  { %v581_v36 = vmul.f32 1.442695, %v580_v35 }
 0x231   :  { %881 = vpow2.f32 %v581_v36 }
 0x237   :  { %v882_v37 = vpop.eup %881 }
 0x238   :  { %583 = vadd.xlane.f32.xlu0 %v882_v37 }
 0x2ab   :  { %v584_v38 = vpop.xlane.xlu0 %583 }
 0x2ac   :  { %883 = vrcp.f32 %v584_v38  ;;  %v596_v42 = vand.u32 2147483648, %v584_v38  ;;  %v594_v44 = vand.u32 2147483647, %v584_v38  ;;  %vm590_vm3 = vweird.f32 %v584_v38 }
 0x2ae   :  { %v597_v47 = vor.u32 1.1754944e-38, %v596_v42  ;;  %vm595_vm5 = vcmp.eq.f32.partialorder %v594_v44, 8.507059e+37 }
 0x2b2   :  { %v884_v39 = vpop.eup %883 }
 0x2b3   :  { %v586_v40 = vmul.f32 %v884_v39, %v584_v38  ;;  %vm591_vm2 = vweird.f32 %v884_v39 }
 0x2b4   :  { %vm592_vm4 = vmor %vm590_vm3, %vm591_vm2 }
 0x2b5   :  { %v587_v41 = vsub.f32 1.0, %v586_v40 }
 0x2b7   :  { %v588_v43 = vmul.f32 %v884_v39, %v587_v41 }
 0x2b9   :  { %v589_v46 = vadd.f32 %v884_v39, %v588_v43 }
 0x2bb   :  { %v593_v48 = vsel %vm592_vm4, %v884_v39, %v589_v46 }
 0x2bc   :  { %v598_v49 = vsel %vm595_vm5, %v597_v47, %v593_v48 }
 0x2bd   :  { %v599_v51 = vmul.f32 %v882_v37, %v598_v49 }
 0x2bf   :  { %v605_v52 = vadd.f32 %v604_v50, %v599_v51 }
 0x2c1   :  { %606 = vst [vmem:[#allocation11] sm:$0xff] %v605_v52 }
 0x2c2   :  { %617 = dma.vmem_to_hbm [thread:$0]  %s613_s18, 128, %s615_s21, [#allocation4]  }
 0x2c3   :  { %1035 = dma.done.wait [#allocation4], 128  }
 0x2c4   :  { %1036 = vsyncadd [#allocation4], 4294967168 }
 0x2c5   :  { %622 = vsyncpa [#allocation3], 1 }
 0x2c6   :  { %623 = vsyncpa [#allocation6], 1 }
 0x2c7   :  { %624 = vsyncpa [#allocation9], 1 }
 0x2c8   :  { %625 = vsyncpa [#allocation4], 1 }

</bundles_post_ra>
